<compile_context>
chip_gen: v6e
topology: v6e:2x2x1
jax: 0.10.0
libtpu: 0.0.40
codegen_flags: <defaults>
</compile_context>

<pallas_src>
import functools

import jax
import jax.numpy as jnp
from jax import lax
from jax.experimental import pallas as pl
from jax.experimental.pallas import tpu as pltpu

EPS = 1e-5


# ----------------------------- fused kernel ---------------------------------

def _fused_ib_kernel(x_ref, w1_ref, b1_ref, wdw_ref, b2_ref, mask_ref,
                     w3_ref, b3_ref, w4_ref, b4_ref, o_ref, *, H, W, Cin, Cm):
    HW = H * W
    x = x_ref[0]                      # (Cin, HW)   channels on sublanes
    w1 = w1_ref[...]                  # (Cm, Cin)   BN1 scale folded in
    wdw = wdw_ref[...]                # (Cm, 9)     BN2 scale folded in
    w3 = w3_ref[...]                  # (Cm, Cm)    BN3 scale folded in
    w4 = w4_ref[...]                  # (Cin, Cm)   BN4 scale folded in

    # ---- stage 1: 1x1 conv + BN + ReLU  (Cin broadcast-FMAs on the VPU) ----
    acc = jnp.zeros((Cm, HW), jnp.float32)
    for k in range(Cin):
        acc = acc + w1[:, k:k + 1] * x[k:k + 1, :]
    h = jnp.maximum(acc + b1_ref[...], 0.0)          # (Cm, HW)

    # ---- stage 2: depthwise 3x3 (pad=1) via lane rolls + boundary masks ----
    # out[c, h, w] = sum_{di,dj} wdw[c, di, dj] * in[c, h+di-1, w+dj-1]
    # With spatial flattened on lanes, the (di, dj) tap is a roll by
    # -(di-1)*W - (dj-1); wrap-around / out-of-bounds lanes are zeroed by the
    # precomputed per-tap mask.
    acc = jnp.zeros((Cm, HW), jnp.float32)
    for di in range(3):
        for dj in range(3):
            t = di * 3 + dj
            off = (di - 1) * W + (dj - 1)
            tap = wdw[:, t:t + 1]                     # (Cm, 1)
            if off == 0:
                acc = acc + h * tap
            else:
                shifted = pltpu.roll(h, shift=(-off) % HW, axis=1)
                acc = acc + (shifted * mask_ref[t:t + 1, :]) * tap
    h = jnp.maximum(acc + b2_ref[...], 0.0)           # (Cm, HW)

    # ---- stage 3: 1x1 conv + BN + ReLU ----
    acc = jnp.zeros((Cm, HW), jnp.float32)
    for k in range(Cm):
        acc = acc + w3[:, k:k + 1] * h[k:k + 1, :]
    h = jnp.maximum(acc + b3_ref[...], 0.0)           # (Cm, HW)

    # ---- stage 4: 1x1 conv + BN, residual add ----
    acc = jnp.zeros((Cin, HW), jnp.float32)
    for k in range(Cm):
        acc = acc + w4[:, k:k + 1] * h[k:k + 1, :]
    o_ref[0] = acc + b4_ref[...] + x                  # (Cin, HW)


# ----------------------------- wrapper ---------------------------------------

def _fold_bn(gamma, beta, mean, var):
    scale = gamma * lax.rsqrt(var + EPS)
    shift = beta - mean * scale
    return scale, shift


def inverted_bottleneck_pallas(x_nchw, w1, bn1, wdw, bn2, w3, bn3, w4, bn4):
    """x_nchw: (N, Cin, H, W). Weights are PyTorch OIHW shaped. Returns NCHW."""
    N, Cin, H, W = x_nchw.shape
    Cm = w1.shape[0]
    HW = H * W

    # --- glue: flatten spatial (NCHW -> (N, C, H*W), lane-dense last dim) ---
    x3d = x_nchw.reshape(N, Cin, HW)

    # --- fold BN (inference, running stats) into conv weights + bias ---
    s1, b1 = _fold_bn(*bn1)
    s2, b2 = _fold_bn(*bn2)
    s3, b3 = _fold_bn(*bn3)
    s4, b4 = _fold_bn(*bn4)

    w1f = w1.reshape(Cm, Cin) * s1[:, None]           # (Cm, Cin)
    wdwf = wdw.reshape(Cm, 9) * s2[:, None]           # (Cm, 9)
    w3f = w3.reshape(Cm, Cm) * s3[:, None]            # (Cm, Cm)
    w4f = w4.reshape(Cin, Cm) * s4[:, None]           # (Cin, Cm)

    # --- per-tap validity masks for the depthwise conv (zero-padding) ---
    pidx = jnp.arange(HW, dtype=jnp.int32)
    row = pidx // W
    col = pidx % W
    mh = [row >= 1, jnp.ones_like(row, dtype=bool), row <= H - 2]
    mw = [col >= 1, jnp.ones_like(col, dtype=bool), col <= W - 2]
    masks = jnp.stack([(mh[di] & mw[dj]).astype(jnp.float32)
                       for di in range(3) for dj in range(3)], axis=0)  # (9,HW)

    kern = functools.partial(_fused_ib_kernel, H=H, W=W, Cin=Cin, Cm=Cm)
    out = pl.pallas_call(
        kern,
        out_shape=jax.ShapeDtypeStruct((N, Cin, HW), jnp.float32),
        grid_spec=pltpu.PrefetchScalarGridSpec(
            num_scalar_prefetch=0,
            grid=(N,),
            in_specs=[
                pl.BlockSpec((1, Cin, HW), lambda n: (n, 0, 0)),   # x
                pl.BlockSpec((Cm, Cin), lambda n: (0, 0)),         # w1f
                pl.BlockSpec((Cm, 1), lambda n: (0, 0)),           # b1
                pl.BlockSpec((Cm, 9), lambda n: (0, 0)),           # wdwf
                pl.BlockSpec((Cm, 1), lambda n: (0, 0)),           # b2
                pl.BlockSpec((9, HW), lambda n: (0, 0)),           # masks
                pl.BlockSpec((Cm, Cm), lambda n: (0, 0)),          # w3f
                pl.BlockSpec((Cm, 1), lambda n: (0, 0)),           # b3
                pl.BlockSpec((Cin, Cm), lambda n: (0, 0)),         # w4f
                pl.BlockSpec((Cin, 1), lambda n: (0, 0)),          # b4
            ],
            out_specs=pl.BlockSpec((1, Cin, HW), lambda n: (n, 0, 0)),
        ),
        compiler_params=pltpu.CompilerParams(
            dimension_semantics=("parallel",)),
    )(x3d, w1f, b1.reshape(Cm, 1), wdwf, b2.reshape(Cm, 1), masks,
      w3f, b3.reshape(Cm, 1), w4f, b4.reshape(Cin, 1))

    return out.reshape(N, Cin, H, W)


# ----------------------------- reference ------------------------------------

def inverted_bottleneck_ref(x, w1, bn1, wdw, bn2, w3, bn3, w4, bn4):
    def bn(t, p):
        gamma, beta, mean, var = p
        inv = lax.rsqrt(var + EPS)
        return ((t - mean[None, :, None, None]) * inv[None, :, None, None]
                * gamma[None, :, None, None] + beta[None, :, None, None])

    def conv(t, w, pad, groups=1):
        return lax.conv_general_dilated(
            t, w, (1, 1), pad, feature_group_count=groups,
            dimension_numbers=("NCHW", "OIHW", "NCHW"),
            precision=lax.Precision.HIGHEST)

    h = jnp.maximum(bn(conv(x, w1, [(0, 0), (0, 0)]), bn1), 0.0)
    h = jnp.maximum(bn(conv(h, wdw, [(1, 1), (1, 1)], groups=wdw.shape[0]),
                       bn2), 0.0)
    h = jnp.maximum(bn(conv(h, w3, [(0, 0), (0, 0)]), bn3), 0.0)
    h = bn(conv(h, w4, [(0, 0), (0, 0)]), bn4)
    return h + x


# ----------------------------- main ------------------------------------------

if __name__ == "__main__":
    N, Cin, H, W = 2, 4, 16, 16
    Cm = 8  # inter_channels

    key = jax.random.PRNGKey(0)
    keys = jax.random.split(key, 9)
    x = jax.random.normal(keys[0], (N, Cin, H, W), jnp.float32)

    w1 = 0.3 * jax.random.normal(keys[1], (Cm, Cin, 1, 1), jnp.float32)
    wdw = 0.3 * jax.random.normal(keys[2], (Cm, 1, 3, 3), jnp.float32)
    w3 = 0.3 * jax.random.normal(keys[3], (Cm, Cm, 1, 1), jnp.float32)
    w4 = 0.3 * jax.random.normal(keys[4], (Cin, Cm, 1, 1), jnp.float32)

    def bn_params(k, C):
        ks = jax.random.split(k, 4)
        gamma = 1.0 + 0.1 * jax.random.normal(ks[0], (C,), jnp.float32)
        beta = 0.1 * jax.random.normal(ks[1], (C,), jnp.float32)
        mean = 0.1 * jax.random.normal(ks[2], (C,), jnp.float32)
        var = 1.0 + 0.1 * jax.random.uniform(ks[3], (C,), jnp.float32)
        return gamma, beta, mean, var

    bn1 = bn_params(keys[5], Cm)
    bn2 = bn_params(keys[6], Cm)
    bn3 = bn_params(keys[7], Cm)
    bn4 = bn_params(keys[8], Cin)

    out = inverted_bottleneck_pallas(x, w1, bn1, wdw, bn2, w3, bn3, w4, bn4)
    out = jax.block_until_ready(out)

    ref = inverted_bottleneck_ref(x, w1, bn1, wdw, bn2, w3, bn3, w4, bn4)
    assert out.shape == x.shape and out.dtype == jnp.float32
    max_err = float(jnp.max(jnp.abs(out - ref)))
    assert max_err < 2e-2, f"mismatch vs reference, max abs err = {max_err}"
    print("KERNEL_OK")
</pallas_src>

<mosaic_0001>
module attributes {stable_mosaic.version = 11 : i64} {
  func.func @_fused_ib_kernel(%arg0: i32, %arg1: memref<1x4x256xf32, #tpu.memory_space<vmem>>, %arg2: memref<8x4xf32, #tpu.memory_space<vmem>>, %arg3: memref<8x1xf32, #tpu.memory_space<vmem>>, %arg4: memref<8x9xf32, #tpu.memory_space<vmem>>, %arg5: memref<8x1xf32, #tpu.memory_space<vmem>>, %arg6: memref<9x256xf32, #tpu.memory_space<vmem>>, %arg7: memref<8x8xf32, #tpu.memory_space<vmem>>, %arg8: memref<8x1xf32, #tpu.memory_space<vmem>>, %arg9: memref<4x8xf32, #tpu.memory_space<vmem>>, %arg10: memref<4x1xf32, #tpu.memory_space<vmem>>, %arg11: memref<1x4x256xf32, #tpu.memory_space<vmem>>) attributes {dimension_semantics = [#tpu.dimension_semantics<parallel>], iteration_bounds = array<i64: 2>, scalar_prefetch = 0 : i64, scratch_operands = 0 : i64, tpu.core_type = #tpu.core_type<tc>, window_params = [{transform_indices = @transform_0, window_bounds = array<i64: 1, 4, 256>}, {pipeline_mode = #tpu.pipeline_mode<synchronous>, transform_indices = @transform_1, window_bounds = array<i64: 8, 4>}, {pipeline_mode = #tpu.pipeline_mode<synchronous>, transform_indices = @transform_2, window_bounds = array<i64: 8, 1>}, {pipeline_mode = #tpu.pipeline_mode<synchronous>, transform_indices = @transform_3, window_bounds = array<i64: 8, 9>}, {pipeline_mode = #tpu.pipeline_mode<synchronous>, transform_indices = @transform_4, window_bounds = array<i64: 8, 1>}, {pipeline_mode = #tpu.pipeline_mode<synchronous>, transform_indices = @transform_5, window_bounds = array<i64: 9, 256>}, {pipeline_mode = #tpu.pipeline_mode<synchronous>, transform_indices = @transform_6, window_bounds = array<i64: 8, 8>}, {pipeline_mode = #tpu.pipeline_mode<synchronous>, transform_indices = @transform_7, window_bounds = array<i64: 8, 1>}, {pipeline_mode = #tpu.pipeline_mode<synchronous>, transform_indices = @transform_8, window_bounds = array<i64: 4, 8>}, {pipeline_mode = #tpu.pipeline_mode<synchronous>, transform_indices = @transform_9, window_bounds = array<i64: 4, 1>}, {transform_indices = @transform_10, window_bounds = array<i64: 1, 4, 256>}]} {
    %c0 = arith.constant 0 : index
    %c0_0 = arith.constant 0 : index
    %c0_1 = arith.constant 0 : index
    %0 = vector.load %arg1[%c0, %c0_0, %c0_1] : memref<1x4x256xf32, #tpu.memory_space<vmem>>, vector<1x4x256xf32>
    %1 = vector.shape_cast %0 : vector<1x4x256xf32> to vector<4x256xf32>
    %c0_2 = arith.constant 0 : index
    %c0_3 = arith.constant 0 : index
    %2 = vector.load %arg2[%c0_2, %c0_3] : memref<8x4xf32, #tpu.memory_space<vmem>>, vector<8x4xf32>
    %c0_4 = arith.constant 0 : index
    %c0_5 = arith.constant 0 : index
    %3 = vector.load %arg4[%c0_4, %c0_5] : memref<8x9xf32, #tpu.memory_space<vmem>>, vector<8x9xf32>
    %c0_6 = arith.constant 0 : index
    %c0_7 = arith.constant 0 : index
    %4 = vector.load %arg7[%c0_6, %c0_7] : memref<8x8xf32, #tpu.memory_space<vmem>>, vector<8x8xf32>
    %c0_8 = arith.constant 0 : index
    %c0_9 = arith.constant 0 : index
    %5 = vector.load %arg9[%c0_8, %c0_9] : memref<4x8xf32, #tpu.memory_space<vmem>>, vector<4x8xf32>
    %cst = arith.constant 0.000000e+00 : f32
    %6 = vector.broadcast %cst : f32 to vector<8x256xf32>
    %7 = vector.extract_strided_slice %2 {offsets = [0, 0], sizes = [8, 1], strides = [1, 1]} : vector<8x4xf32> to vector<8x1xf32>
    %8 = vector.extract_strided_slice %1 {offsets = [0, 0], sizes = [1, 256], strides = [1, 1]} : vector<4x256xf32> to vector<1x256xf32>
    %9 = vector.broadcast %7 : vector<8x1xf32> to vector<8x256xf32>
    %10 = vector.broadcast %8 : vector<1x256xf32> to vector<8x256xf32>
    %11 = arith.mulf %9, %10 : vector<8x256xf32>
    %12 = arith.addf %6, %11 : vector<8x256xf32>
    %13 = vector.extract_strided_slice %2 {offsets = [0, 1], sizes = [8, 1], strides = [1, 1]} : vector<8x4xf32> to vector<8x1xf32>
    %14 = vector.extract_strided_slice %1 {offsets = [1, 0], sizes = [1, 256], strides = [1, 1]} : vector<4x256xf32> to vector<1x256xf32>
    %15 = vector.broadcast %13 : vector<8x1xf32> to vector<8x256xf32>
    %16 = vector.broadcast %14 : vector<1x256xf32> to vector<8x256xf32>
    %17 = arith.mulf %15, %16 : vector<8x256xf32>
    %18 = arith.addf %12, %17 : vector<8x256xf32>
    %19 = vector.extract_strided_slice %2 {offsets = [0, 2], sizes = [8, 1], strides = [1, 1]} : vector<8x4xf32> to vector<8x1xf32>
    %20 = vector.extract_strided_slice %1 {offsets = [2, 0], sizes = [1, 256], strides = [1, 1]} : vector<4x256xf32> to vector<1x256xf32>
    %21 = vector.broadcast %19 : vector<8x1xf32> to vector<8x256xf32>
    %22 = vector.broadcast %20 : vector<1x256xf32> to vector<8x256xf32>
    %23 = arith.mulf %21, %22 : vector<8x256xf32>
    %24 = arith.addf %18, %23 : vector<8x256xf32>
    %25 = vector.extract_strided_slice %2 {offsets = [0, 3], sizes = [8, 1], strides = [1, 1]} : vector<8x4xf32> to vector<8x1xf32>
    %26 = vector.extract_strided_slice %1 {offsets = [3, 0], sizes = [1, 256], strides = [1, 1]} : vector<4x256xf32> to vector<1x256xf32>
    %27 = vector.broadcast %25 : vector<8x1xf32> to vector<8x256xf32>
    %28 = vector.broadcast %26 : vector<1x256xf32> to vector<8x256xf32>
    %29 = arith.mulf %27, %28 : vector<8x256xf32>
    %30 = arith.addf %24, %29 : vector<8x256xf32>
    %c0_10 = arith.constant 0 : index
    %c0_11 = arith.constant 0 : index
    %31 = vector.load %arg3[%c0_10, %c0_11] : memref<8x1xf32, #tpu.memory_space<vmem>>, vector<8x1xf32>
    %32 = vector.broadcast %31 : vector<8x1xf32> to vector<8x256xf32>
    %33 = arith.addf %30, %32 : vector<8x256xf32>
    %cst_12 = arith.constant 0.000000e+00 : f32
    %34 = vector.broadcast %cst_12 : f32 to vector<8x256xf32>
    %35 = arith.maximumf %33, %34 : vector<8x256xf32>
    %cst_13 = arith.constant 0.000000e+00 : f32
    %36 = vector.broadcast %cst_13 : f32 to vector<8x256xf32>
    %37 = vector.extract_strided_slice %3 {offsets = [0, 0], sizes = [8, 1], strides = [1, 1]} : vector<8x9xf32> to vector<8x1xf32>
    %c17_i32 = arith.constant 17 : i32
    %38 = tpu.dynamic_rotate %35 by %c17_i32 dim 1 : vector<8x256xf32>, i32 -> vector<8x256xf32>
    %c0_14 = arith.constant 0 : index
    %c0_15 = arith.constant 0 : index
    %39 = vector.load %arg6[%c0_14, %c0_15] : memref<9x256xf32, #tpu.memory_space<vmem>>, vector<1x256xf32>
    %40 = vector.broadcast %39 : vector<1x256xf32> to vector<8x256xf32>
    %41 = arith.mulf %38, %40 : vector<8x256xf32>
    %42 = vector.broadcast %37 : vector<8x1xf32> to vector<8x256xf32>
    %43 = arith.mulf %41, %42 : vector<8x256xf32>
    %44 = arith.addf %36, %43 : vector<8x256xf32>
    %45 = vector.extract_strided_slice %3 {offsets = [0, 1], sizes = [8, 1], strides = [1, 1]} : vector<8x9xf32> to vector<8x1xf32>
    %c16_i32 = arith.constant 16 : i32
    %46 = tpu.dynamic_rotate %35 by %c16_i32 dim 1 : vector<8x256xf32>, i32 -> vector<8x256xf32>
    %c1 = arith.constant 1 : index
    %c0_16 = arith.constant 0 : index
    %47 = vector.load %arg6[%c1, %c0_16] : memref<9x256xf32, #tpu.memory_space<vmem>>, vector<1x256xf32>
    %48 = vector.broadcast %47 : vector<1x256xf32> to vector<8x256xf32>
    %49 = arith.mulf %46, %48 : vector<8x256xf32>
    %50 = vector.broadcast %45 : vector<8x1xf32> to vector<8x256xf32>
    %51 = arith.mulf %49, %50 : vector<8x256xf32>
    %52 = arith.addf %44, %51 : vector<8x256xf32>
    %53 = vector.extract_strided_slice %3 {offsets = [0, 2], sizes = [8, 1], strides = [1, 1]} : vector<8x9xf32> to vector<8x1xf32>
    %c15_i32 = arith.constant 15 : i32
    %54 = tpu.dynamic_rotate %35 by %c15_i32 dim 1 : vector<8x256xf32>, i32 -> vector<8x256xf32>
    %c2 = arith.constant 2 : index
    %c0_17 = arith.constant 0 : index
    %55 = vector.load %arg6[%c2, %c0_17] : memref<9x256xf32, #tpu.memory_space<vmem>>, vector<1x256xf32>
    %56 = vector.broadcast %55 : vector<1x256xf32> to vector<8x256xf32>
    %57 = arith.mulf %54, %56 : vector<8x256xf32>
    %58 = vector.broadcast %53 : vector<8x1xf32> to vector<8x256xf32>
    %59 = arith.mulf %57, %58 : vector<8x256xf32>
    %60 = arith.addf %52, %59 : vector<8x256xf32>
    %61 = vector.extract_strided_slice %3 {offsets = [0, 3], sizes = [8, 1], strides = [1, 1]} : vector<8x9xf32> to vector<8x1xf32>
    %c1_i32 = arith.constant 1 : i32
    %62 = tpu.dynamic_rotate %35 by %c1_i32 dim 1 : vector<8x256xf32>, i32 -> vector<8x256xf32>
    %c3 = arith.constant 3 : index
    %c0_18 = arith.constant 0 : index
    %63 = vector.load %arg6[%c3, %c0_18] : memref<9x256xf32, #tpu.memory_space<vmem>>, vector<1x256xf32>
    %64 = vector.broadcast %63 : vector<1x256xf32> to vector<8x256xf32>
    %65 = arith.mulf %62, %64 : vector<8x256xf32>
    %66 = vector.broadcast %61 : vector<8x1xf32> to vector<8x256xf32>
    %67 = arith.mulf %65, %66 : vector<8x256xf32>
    %68 = arith.addf %60, %67 : vector<8x256xf32>
    %69 = vector.extract_strided_slice %3 {offsets = [0, 4], sizes = [8, 1], strides = [1, 1]} : vector<8x9xf32> to vector<8x1xf32>
    %70 = vector.broadcast %69 : vector<8x1xf32> to vector<8x256xf32>
    %71 = arith.mulf %35, %70 : vector<8x256xf32>
    %72 = arith.addf %68, %71 : vector<8x256xf32>
    %73 = vector.extract_strided_slice %3 {offsets = [0, 5], sizes = [8, 1], strides = [1, 1]} : vector<8x9xf32> to vector<8x1xf32>
    %c255_i32 = arith.constant 255 : i32
    %74 = tpu.dynamic_rotate %35 by %c255_i32 dim 1 : vector<8x256xf32>, i32 -> vector<8x256xf32>
    %c5 = arith.constant 5 : index
    %c0_19 = arith.constant 0 : index
    %75 = vector.load %arg6[%c5, %c0_19] : memref<9x256xf32, #tpu.memory_space<vmem>>, vector<1x256xf32>
    %76 = vector.broadcast %75 : vector<1x256xf32> to vector<8x256xf32>
    %77 = arith.mulf %74, %76 : vector<8x256xf32>
    %78 = vector.broadcast %73 : vector<8x1xf32> to vector<8x256xf32>
    %79 = arith.mulf %77, %78 : vector<8x256xf32>
    %80 = arith.addf %72, %79 : vector<8x256xf32>
    %81 = vector.extract_strided_slice %3 {offsets = [0, 6], sizes = [8, 1], strides = [1, 1]} : vector<8x9xf32> to vector<8x1xf32>
    %c241_i32 = arith.constant 241 : i32
    %82 = tpu.dynamic_rotate %35 by %c241_i32 dim 1 : vector<8x256xf32>, i32 -> vector<8x256xf32>
    %c6 = arith.constant 6 : index
    %c0_20 = arith.constant 0 : index
    %83 = vector.load %arg6[%c6, %c0_20] : memref<9x256xf32, #tpu.memory_space<vmem>>, vector<1x256xf32>
    %84 = vector.broadcast %83 : vector<1x256xf32> to vector<8x256xf32>
    %85 = arith.mulf %82, %84 : vector<8x256xf32>
    %86 = vector.broadcast %81 : vector<8x1xf32> to vector<8x256xf32>
    %87 = arith.mulf %85, %86 : vector<8x256xf32>
    %88 = arith.addf %80, %87 : vector<8x256xf32>
    %89 = vector.extract_strided_slice %3 {offsets = [0, 7], sizes = [8, 1], strides = [1, 1]} : vector<8x9xf32> to vector<8x1xf32>
    %c240_i32 = arith.constant 240 : i32
    %90 = tpu.dynamic_rotate %35 by %c240_i32 dim 1 : vector<8x256xf32>, i32 -> vector<8x256xf32>
    %c7 = arith.constant 7 : index
    %c0_21 = arith.constant 0 : index
    %91 = vector.load %arg6[%c7, %c0_21] : memref<9x256xf32, #tpu.memory_space<vmem>>, vector<1x256xf32>
    %92 = vector.broadcast %91 : vector<1x256xf32> to vector<8x256xf32>
    %93 = arith.mulf %90, %92 : vector<8x256xf32>
    %94 = vector.broadcast %89 : vector<8x1xf32> to vector<8x256xf32>
    %95 = arith.mulf %93, %94 : vector<8x256xf32>
    %96 = arith.addf %88, %95 : vector<8x256xf32>
    %97 = vector.extract_strided_slice %3 {offsets = [0, 8], sizes = [8, 1], strides = [1, 1]} : vector<8x9xf32> to vector<8x1xf32>
    %c239_i32 = arith.constant 239 : i32
    %98 = tpu.dynamic_rotate %35 by %c239_i32 dim 1 : vector<8x256xf32>, i32 -> vector<8x256xf32>
    %c8 = arith.constant 8 : index
    %c0_22 = arith.constant 0 : index
    %99 = vector.load %arg6[%c8, %c0_22] : memref<9x256xf32, #tpu.memory_space<vmem>>, vector<1x256xf32>
    %100 = vector.broadcast %99 : vector<1x256xf32> to vector<8x256xf32>
    %101 = arith.mulf %98, %100 : vector<8x256xf32>
    %102 = vector.broadcast %97 : vector<8x1xf32> to vector<8x256xf32>
    %103 = arith.mulf %101, %102 : vector<8x256xf32>
    %104 = arith.addf %96, %103 : vector<8x256xf32>
    %c0_23 = arith.constant 0 : index
    %c0_24 = arith.constant 0 : index
    %105 = vector.load %arg5[%c0_23, %c0_24] : memref<8x1xf32, #tpu.memory_space<vmem>>, vector<8x1xf32>
    %106 = vector.broadcast %105 : vector<8x1xf32> to vector<8x256xf32>
    %107 = arith.addf %104, %106 : vector<8x256xf32>
    %cst_25 = arith.constant 0.000000e+00 : f32
    %108 = vector.broadcast %cst_25 : f32 to vector<8x256xf32>
    %109 = arith.maximumf %107, %108 : vector<8x256xf32>
    %cst_26 = arith.constant 0.000000e+00 : f32
    %110 = vector.broadcast %cst_26 : f32 to vector<8x256xf32>
    %111 = vector.extract_strided_slice %4 {offsets = [0, 0], sizes = [8, 1], strides = [1, 1]} : vector<8x8xf32> to vector<8x1xf32>
    %112 = vector.extract_strided_slice %109 {offsets = [0, 0], sizes = [1, 256], strides = [1, 1]} : vector<8x256xf32> to vector<1x256xf32>
    %113 = vector.broadcast %111 : vector<8x1xf32> to vector<8x256xf32>
    %114 = vector.broadcast %112 : vector<1x256xf32> to vector<8x256xf32>
    %115 = arith.mulf %113, %114 : vector<8x256xf32>
    %116 = arith.addf %110, %115 : vector<8x256xf32>
    %117 = vector.extract_strided_slice %4 {offsets = [0, 1], sizes = [8, 1], strides = [1, 1]} : vector<8x8xf32> to vector<8x1xf32>
    %118 = vector.extract_strided_slice %109 {offsets = [1, 0], sizes = [1, 256], strides = [1, 1]} : vector<8x256xf32> to vector<1x256xf32>
    %119 = vector.broadcast %117 : vector<8x1xf32> to vector<8x256xf32>
    %120 = vector.broadcast %118 : vector<1x256xf32> to vector<8x256xf32>
    %121 = arith.mulf %119, %120 : vector<8x256xf32>
    %122 = arith.addf %116, %121 : vector<8x256xf32>
    %123 = vector.extract_strided_slice %4 {offsets = [0, 2], sizes = [8, 1], strides = [1, 1]} : vector<8x8xf32> to vector<8x1xf32>
    %124 = vector.extract_strided_slice %109 {offsets = [2, 0], sizes = [1, 256], strides = [1, 1]} : vector<8x256xf32> to vector<1x256xf32>
    %125 = vector.broadcast %123 : vector<8x1xf32> to vector<8x256xf32>
    %126 = vector.broadcast %124 : vector<1x256xf32> to vector<8x256xf32>
    %127 = arith.mulf %125, %126 : vector<8x256xf32>
    %128 = arith.addf %122, %127 : vector<8x256xf32>
    %129 = vector.extract_strided_slice %4 {offsets = [0, 3], sizes = [8, 1], strides = [1, 1]} : vector<8x8xf32> to vector<8x1xf32>
    %130 = vector.extract_strided_slice %109 {offsets = [3, 0], sizes = [1, 256], strides = [1, 1]} : vector<8x256xf32> to vector<1x256xf32>
    %131 = vector.broadcast %129 : vector<8x1xf32> to vector<8x256xf32>
    %132 = vector.broadcast %130 : vector<1x256xf32> to vector<8x256xf32>
    %133 = arith.mulf %131, %132 : vector<8x256xf32>
    %134 = arith.addf %128, %133 : vector<8x256xf32>
    %135 = vector.extract_strided_slice %4 {offsets = [0, 4], sizes = [8, 1], strides = [1, 1]} : vector<8x8xf32> to vector<8x1xf32>
    %136 = vector.extract_strided_slice %109 {offsets = [4, 0], sizes = [1, 256], strides = [1, 1]} : vector<8x256xf32> to vector<1x256xf32>
    %137 = vector.broadcast %135 : vector<8x1xf32> to vector<8x256xf32>
    %138 = vector.broadcast %136 : vector<1x256xf32> to vector<8x256xf32>
    %139 = arith.mulf %137, %138 : vector<8x256xf32>
    %140 = arith.addf %134, %139 : vector<8x256xf32>
    %141 = vector.extract_strided_slice %4 {offsets = [0, 5], sizes = [8, 1], strides = [1, 1]} : vector<8x8xf32> to vector<8x1xf32>
    %142 = vector.extract_strided_slice %109 {offsets = [5, 0], sizes = [1, 256], strides = [1, 1]} : vector<8x256xf32> to vector<1x256xf32>
    %143 = vector.broadcast %141 : vector<8x1xf32> to vector<8x256xf32>
    %144 = vector.broadcast %142 : vector<1x256xf32> to vector<8x256xf32>
    %145 = arith.mulf %143, %144 : vector<8x256xf32>
    %146 = arith.addf %140, %145 : vector<8x256xf32>
    %147 = vector.extract_strided_slice %4 {offsets = [0, 6], sizes = [8, 1], strides = [1, 1]} : vector<8x8xf32> to vector<8x1xf32>
    %148 = vector.extract_strided_slice %109 {offsets = [6, 0], sizes = [1, 256], strides = [1, 1]} : vector<8x256xf32> to vector<1x256xf32>
    %149 = vector.broadcast %147 : vector<8x1xf32> to vector<8x256xf32>
    %150 = vector.broadcast %148 : vector<1x256xf32> to vector<8x256xf32>
    %151 = arith.mulf %149, %150 : vector<8x256xf32>
    %152 = arith.addf %146, %151 : vector<8x256xf32>
    %153 = vector.extract_strided_slice %4 {offsets = [0, 7], sizes = [8, 1], strides = [1, 1]} : vector<8x8xf32> to vector<8x1xf32>
    %154 = vector.extract_strided_slice %109 {offsets = [7, 0], sizes = [1, 256], strides = [1, 1]} : vector<8x256xf32> to vector<1x256xf32>
    %155 = vector.broadcast %153 : vector<8x1xf32> to vector<8x256xf32>
    %156 = vector.broadcast %154 : vector<1x256xf32> to vector<8x256xf32>
    %157 = arith.mulf %155, %156 : vector<8x256xf32>
    %158 = arith.addf %152, %157 : vector<8x256xf32>
    %c0_27 = arith.constant 0 : index
    %c0_28 = arith.constant 0 : index
    %159 = vector.load %arg8[%c0_27, %c0_28] : memref<8x1xf32, #tpu.memory_space<vmem>>, vector<8x1xf32>
    %160 = vector.broadcast %159 : vector<8x1xf32> to vector<8x256xf32>
    %161 = arith.addf %158, %160 : vector<8x256xf32>
    %cst_29 = arith.constant 0.000000e+00 : f32
    %162 = vector.broadcast %cst_29 : f32 to vector<8x256xf32>
    %163 = arith.maximumf %161, %162 : vector<8x256xf32>
    %cst_30 = arith.constant 0.000000e+00 : f32
    %164 = vector.broadcast %cst_30 : f32 to vector<4x256xf32>
    %165 = vector.extract_strided_slice %5 {offsets = [0, 0], sizes = [4, 1], strides = [1, 1]} : vector<4x8xf32> to vector<4x1xf32>
    %166 = vector.extract_strided_slice %163 {offsets = [0, 0], sizes = [1, 256], strides = [1, 1]} : vector<8x256xf32> to vector<1x256xf32>
    %167 = vector.broadcast %165 : vector<4x1xf32> to vector<4x256xf32>
    %168 = vector.broadcast %166 : vector<1x256xf32> to vector<4x256xf32>
    %169 = arith.mulf %167, %168 : vector<4x256xf32>
    %170 = arith.addf %164, %169 : vector<4x256xf32>
    %171 = vector.extract_strided_slice %5 {offsets = [0, 1], sizes = [4, 1], strides = [1, 1]} : vector<4x8xf32> to vector<4x1xf32>
    %172 = vector.extract_strided_slice %163 {offsets = [1, 0], sizes = [1, 256], strides = [1, 1]} : vector<8x256xf32> to vector<1x256xf32>
    %173 = vector.broadcast %171 : vector<4x1xf32> to vector<4x256xf32>
    %174 = vector.broadcast %172 : vector<1x256xf32> to vector<4x256xf32>
    %175 = arith.mulf %173, %174 : vector<4x256xf32>
    %176 = arith.addf %170, %175 : vector<4x256xf32>
    %177 = vector.extract_strided_slice %5 {offsets = [0, 2], sizes = [4, 1], strides = [1, 1]} : vector<4x8xf32> to vector<4x1xf32>
    %178 = vector.extract_strided_slice %163 {offsets = [2, 0], sizes = [1, 256], strides = [1, 1]} : vector<8x256xf32> to vector<1x256xf32>
    %179 = vector.broadcast %177 : vector<4x1xf32> to vector<4x256xf32>
    %180 = vector.broadcast %178 : vector<1x256xf32> to vector<4x256xf32>
    %181 = arith.mulf %179, %180 : vector<4x256xf32>
    %182 = arith.addf %176, %181 : vector<4x256xf32>
    %183 = vector.extract_strided_slice %5 {offsets = [0, 3], sizes = [4, 1], strides = [1, 1]} : vector<4x8xf32> to vector<4x1xf32>
    %184 = vector.extract_strided_slice %163 {offsets = [3, 0], sizes = [1, 256], strides = [1, 1]} : vector<8x256xf32> to vector<1x256xf32>
    %185 = vector.broadcast %183 : vector<4x1xf32> to vector<4x256xf32>
    %186 = vector.broadcast %184 : vector<1x256xf32> to vector<4x256xf32>
    %187 = arith.mulf %185, %186 : vector<4x256xf32>
    %188 = arith.addf %182, %187 : vector<4x256xf32>
    %189 = vector.extract_strided_slice %5 {offsets = [0, 4], sizes = [4, 1], strides = [1, 1]} : vector<4x8xf32> to vector<4x1xf32>
    %190 = vector.extract_strided_slice %163 {offsets = [4, 0], sizes = [1, 256], strides = [1, 1]} : vector<8x256xf32> to vector<1x256xf32>
    %191 = vector.broadcast %189 : vector<4x1xf32> to vector<4x256xf32>
    %192 = vector.broadcast %190 : vector<1x256xf32> to vector<4x256xf32>
    %193 = arith.mulf %191, %192 : vector<4x256xf32>
    %194 = arith.addf %188, %193 : vector<4x256xf32>
    %195 = vector.extract_strided_slice %5 {offsets = [0, 5], sizes = [4, 1], strides = [1, 1]} : vector<4x8xf32> to vector<4x1xf32>
    %196 = vector.extract_strided_slice %163 {offsets = [5, 0], sizes = [1, 256], strides = [1, 1]} : vector<8x256xf32> to vector<1x256xf32>
    %197 = vector.broadcast %195 : vector<4x1xf32> to vector<4x256xf32>
    %198 = vector.broadcast %196 : vector<1x256xf32> to vector<4x256xf32>
    %199 = arith.mulf %197, %198 : vector<4x256xf32>
    %200 = arith.addf %194, %199 : vector<4x256xf32>
    %201 = vector.extract_strided_slice %5 {offsets = [0, 6], sizes = [4, 1], strides = [1, 1]} : vector<4x8xf32> to vector<4x1xf32>
    %202 = vector.extract_strided_slice %163 {offsets = [6, 0], sizes = [1, 256], strides = [1, 1]} : vector<8x256xf32> to vector<1x256xf32>
    %203 = vector.broadcast %201 : vector<4x1xf32> to vector<4x256xf32>
    %204 = vector.broadcast %202 : vector<1x256xf32> to vector<4x256xf32>
    %205 = arith.mulf %203, %204 : vector<4x256xf32>
    %206 = arith.addf %200, %205 : vector<4x256xf32>
    %207 = vector.extract_strided_slice %5 {offsets = [0, 7], sizes = [4, 1], strides = [1, 1]} : vector<4x8xf32> to vector<4x1xf32>
    %208 = vector.extract_strided_slice %163 {offsets = [7, 0], sizes = [1, 256], strides = [1, 1]} : vector<8x256xf32> to vector<1x256xf32>
    %209 = vector.broadcast %207 : vector<4x1xf32> to vector<4x256xf32>
    %210 = vector.broadcast %208 : vector<1x256xf32> to vector<4x256xf32>
    %211 = arith.mulf %209, %210 : vector<4x256xf32>
    %212 = arith.addf %206, %211 : vector<4x256xf32>
    %c0_31 = arith.constant 0 : index
    %c0_32 = arith.constant 0 : index
    %213 = vector.load %arg10[%c0_31, %c0_32] : memref<4x1xf32, #tpu.memory_space<vmem>>, vector<4x1xf32>
    %214 = vector.broadcast %213 : vector<4x1xf32> to vector<4x256xf32>
    %215 = arith.addf %212, %214 : vector<4x256xf32>
    %216 = arith.addf %215, %1 : vector<4x256xf32>
    %c0_33 = arith.constant 0 : index
    %c0_34 = arith.constant 0 : index
    %c0_35 = arith.constant 0 : index
    %217 = vector.load %arg11[%c0_33, %c0_34, %c0_35] : memref<1x4x256xf32, #tpu.memory_space<vmem>>, vector<1x4x256xf32>
    %218 = vector.shape_cast %217 : vector<1x4x256xf32> to vector<4x256xf32>
    %219 = vector.shape_cast %216 : vector<4x256xf32> to vector<1x4x256xf32>
    tpu.vector_store %arg11[%c0_33, %c0_34, %c0_35], %219 {strides = array<i32>} : memref<1x4x256xf32, #tpu.memory_space<vmem>>, vector<1x4x256xf32>,
    return
  }
  func.func @transform_0(%arg0: i32) -> (i32, i32, i32) {
    %c0_i32 = arith.constant 0 : i32
    %c0_i32_0 = arith.constant 0 : i32
    %c0_i32_1 = arith.constant 0 : i32
    return %arg0, %c0_i32, %c0_i32_0 : i32, i32, i32
  }
  func.func @transform_1(%arg0: i32) -> (i32, i32) {
    %c0_i32 = arith.constant 0 : i32
    %c0_i32_0 = arith.constant 0 : i32
    %c0_i32_1 = arith.constant 0 : i32
    return %c0_i32, %c0_i32_0 : i32, i32
  }
  func.func @transform_2(%arg0: i32) -> (i32, i32) {
    %c0_i32 = arith.constant 0 : i32
    %c0_i32_0 = arith.constant 0 : i32
    %c0_i32_1 = arith.constant 0 : i32
    return %c0_i32, %c0_i32_0 : i32, i32
  }
  func.func @transform_3(%arg0: i32) -> (i32, i32) {
    %c0_i32 = arith.constant 0 : i32
    %c0_i32_0 = arith.constant 0 : i32
    %c0_i32_1 = arith.constant 0 : i32
    return %c0_i32, %c0_i32_0 : i32, i32
  }
  func.func @transform_4(%arg0: i32) -> (i32, i32) {
    %c0_i32 = arith.constant 0 : i32
    %c0_i32_0 = arith.constant 0 : i32
    %c0_i32_1 = arith.constant 0 : i32
    return %c0_i32, %c0_i32_0 : i32, i32
  }
  func.func @transform_5(%arg0: i32) -> (i32, i32) {
    %c0_i32 = arith.constant 0 : i32
    %c0_i32_0 = arith.constant 0 : i32
    %c0_i32_1 = arith.constant 0 : i32
    return %c0_i32, %c0_i32_0 : i32, i32
  }
  func.func @transform_6(%arg0: i32) -> (i32, i32) {
    %c0_i32 = arith.constant 0 : i32
    %c0_i32_0 = arith.constant 0 : i32
    %c0_i32_1 = arith.constant 0 : i32
    return %c0_i32, %c0_i32_0 : i32, i32
  }
  func.func @transform_7(%arg0: i32) -> (i32, i32) {
    %c0_i32 = arith.constant 0 : i32
    %c0_i32_0 = arith.constant 0 : i32
    %c0_i32_1 = arith.constant 0 : i32
    return %c0_i32, %c0_i32_0 : i32, i32
  }
  func.func @transform_8(%arg0: i32) -> (i32, i32) {
    %c0_i32 = arith.constant 0 : i32
    %c0_i32_0 = arith.constant 0 : i32
    %c0_i32_1 = arith.constant 0 : i32
    return %c0_i32, %c0_i32_0 : i32, i32
  }
  func.func @transform_9(%arg0: i32) -> (i32, i32) {
    %c0_i32 = arith.constant 0 : i32
    %c0_i32_0 = arith.constant 0 : i32
    %c0_i32_1 = arith.constant 0 : i32
    return %c0_i32, %c0_i32_0 : i32, i32
  }
  func.func @transform_10(%arg0: i32) -> (i32, i32, i32) {
    %c0_i32 = arith.constant 0 : i32
    %c0_i32_0 = arith.constant 0 : i32
    %c0_i32_1 = arith.constant 0 : i32
    return %arg0, %c0_i32, %c0_i32_0 : i32, i32, i32
  }
}

</mosaic_0001>

<bundles_post_ra>
// kernel: tpu_custom_call.1
= control target key start
LH: loop header
LB: loop body
LE: loop exit
PB: predicated region body
PF: predicated region fallthrough
CT: control target
= control target key end

     0   :  { %s1836_s0 = inlined_call_operand.vmem [shape: f32[2,4,256], index: 0, kind: input, shape index: {}]   ;;  %s1837_s1 = inlined_call_operand.vmem [shape: f32[8,4], index: 1, kind: input, shape index: {}]   ;;  %s1838_s2 = inlined_call_operand.vmem [shape: f32[8,1], index: 2, kind: input, shape index: {}]   ;;  %s1839_s3 = inlined_call_operand.hbm [shape: f32[8,9], index: 3, kind: input, shape index: {}]   ;;  %s1840_s4 = inlined_call_operand.vmem [shape: f32[8,1], index: 4, kind: input, shape index: {}]   ;;  %s1841_s5 = inlined_call_operand.vmem [shape: f32[9,256], index: 5, kind: input, shape index: {}]   ;;  %s1842_s6 = inlined_call_operand.hbm [shape: f32[8,8], index: 6, kind: input, shape index: {}]   ;;  %s1843_s7 = inlined_call_operand.vmem [shape: f32[8,1], index: 7, kind: input, shape index: {}]   ;;  %s1844_s8 = inlined_call_operand.vmem [shape: f32[4,8], index: 8, kind: input, shape index: {}]   ;;  %s1845_s9 = inlined_call_operand.vmem [shape: f32[4,1], index: 9, kind: input, shape index: {}]   ;;  %s1846_s10 = inlined_call_operand.hbm [shape: f32[2,4,256], index: 10, kind: output, shape index: {}]  }
   0x1   :  { %1850 = sst [smem:[#allocation11_spill]] %s1836_s0 }
   0x2   :  { %15 = vsyncpa [#allocation3], 0 }
   0x3   :  { %16 = vsyncpa [#allocation6], 0 }
   0x4   :  { %17 = vsyncpa [#allocation4], 0 }
   0x5   :  { %19 = vsyncpa [#allocation4 + $0x1], 0  ;;  %s1477_s13 = smov 0   ;;  %s1479_s14 = smov 0  }
   0x6   :  { %s1481_s15 = smov 0   ;;  %s1483_s16 = smov 0  }
   0x7 LB: > { %s1498_s17 = sadd.s32 4294967295, %s1400_s16   ;;  %s1146_s18 = sadd.s32 4294967294, %s1400_s16   ;;  %s1400_s16 = sphi %s1483_s16, %s1866_s16   ;;  %s1396_s15 = sphi %s1481_s15, %s1865_s15   ;;  %s1392_s14 = sphi %s1479_s14, %s1864_s14   ;;  %s1388_s13 = sphi %s1477_s13, %s1863_s13  }
   0x8   : > { %s1502_s19 = sadd.s32 1, %s1400_s16   ;;  %s247_s20 = sadd.s32 1, %s1396_s15 }
   0x9   : > { %s244_s21 = ssub.s32 %s1400_s16, %s1502_s19  ;;  %p257_p0 = scmp.ne.s32.totalorder %s1396_s15, %s1392_s14 }
   0xa   : > { %p245_p1 = scmp.eq.s32.totalorder %s244_s21, 0  ;;  %p258_p2 = scmp.eq.s32.totalorder %s1498_s17, 1 }
   0xb   : > { %p263_p3 = scmp.ne.s32.totalorder %s1392_s14, %s1388_s13  ;;  %p264_p4 = scmp.eq.s32.totalorder %s1146_s18, 1 }
   0xc   : > { %s1513_s22 = scalar_select %p245_p1, %s1396_s15, %s247_s20  }
   0xd   : > { %p1515_p5 = por %p258_p2, %p257_p0  ;;  %p1519_p6 = por %p264_p4, %p263_p3 }
   0xe   : > { %p1147_p7 = scmp.ge.s32.totalorder %s1400_s16, 1  ;;  %p271_p8 = scmp.lt.s32.totalorder %s1400_s16, 3 }
   0xf   : > { %s1851_s23 = scalar_select %p1515_p5, 1, 0 }
  0x10   : > { %s1852_s24 = scalar_select %p1519_p6, 1, 0 }
  0x11   : > { %p1847_p9 = scmp.eq.s32.totalorder %s1498_s17, 0  ;;  %p1526_p10 = pnand %p1147_p7, %p271_p8 }
  0x12   : > { %s1402_s26 = smov [#allocation2]   ;;  %s1403_s28 = smov [#allocation5]  }
  0x13   : > { %s1853_s25 = scalar_select %p1526_p10, 1, 0 }
  0x14   : > { %s290_s27 = sshll.u32 %s1402_s26, 4  ;;  %p1181_p11 = pneg %p1526_p10  ;;  %s291_s27 = int_to_ptr.vmem [resolvable:$true] %s290_s27 }
  0x15   : > { %s307_s29 = sshll.u32 %s1403_s28, 4  ;;  %s1291_s11 = scalar_lea.vmem %s291_s27, 128  ;;  %s308_s29 = int_to_ptr.vmem [resolvable:$true] %s307_s29 }
  0x16   : > { %p1534_p12 = pnand %p1847_p9, %p1181_p11  ;;  %p1292_p0 = scmp.ne.s32.totalorder %s291_s27, %s1291_s11 }
  0x17   : > { %p1299_p3 = scmp.lt.s32.totalorder %s291_s27, %s291_s27  ;;  %p1300_p4 = scmp.lt.s32.totalorder %s1291_s11, %s1291_s11 }
  0x18   : > { %p1282_p13 = pneg %p1534_p12 }
  0x19   : > { %p1301_p7 = por %p1300_p4, %p1299_p3 }
  0x1a   : > { %p1294_p1 = pnand %p1292_p0, %p1282_p13 }
  0x1c   : > { %p1295_p2 = pneg %p1294_p1 }
  0x1e   : > { %p1302_p8 = pnand %p1301_p7, %p1295_p2 }
  0x20   : > { %1305 = shalt.err (!%p1302_p8)
}
  0x21   : > { %1184 = dma.hbm_to_vmem [thread:$0]  (!%p1534_p12), %s1839_s3, 128, %s291_s27, [#allocation3]  }
  0x22   : > { %s1317_s20 = scalar_lea.vmem %s308_s29, 128  ;;  %p1325_p0 = scmp.lt.s32.totalorder %s308_s29, %s308_s29 }
  0x23   : > { %p1318_p11 = scmp.ne.s32.totalorder %s308_s29, %s1317_s20  ;;  %p1326_p1 = scmp.lt.s32.totalorder %s1317_s20, %s1317_s20 }
  0x25   : > { %p1320_p9 = pnand %p1318_p11, %p1282_p13  ;;  %p1327_p5 = por %p1326_p1, %p1325_p0 }
  0x27   : > { %p1321_p6 = pneg %p1320_p9 }
  0x29   : > { %p1328_p10 = pnand %p1327_p5, %p1321_p6 }
  0x2b   : > { %1331 = shalt.err (!%p1328_p10)
}
  0x2c   : > { %1187 = dma.hbm_to_vmem [thread:$0]  (!%p1534_p12), %s1842_s6, 128, %s308_s29, [#allocation6]  }
  0x2d   : > { %p1855_p2 = scmp.ne.s32.totalorder %s1853_s25, 0 }
  0x2e   : > { %p1856_p3 = scmp.eq.s32.totalorder (!%p1855_p2), %s1498_s17, 0 }
  0x2f   : > { %337 = sbr.rel (%p1855_p2) target bundleno = 444 (0x1bc), region = 60 }
  0x34   : > { %1375 = dma.done.wait (%p1856_p3), [#allocation3], 128   ;;  %p1857_p13 = pmov %p1856_p3 }
  0x35   : > { %p1858_p9 = pmov %p1856_p3 }
  0x36   : > { %1377 = vsyncadd (%p1857_p13), [#allocation3], 4294967168 }
  0x37   : > { %1379 = dma.done.wait (%p1858_p9), [#allocation6], 128   ;;  %p1859_p5 = pmov %p1856_p3 }
  0x38   : > { %v1404_v0 = vmov 0   ;;  %v1405_v1 = vmov 2   ;;  %v385_v2 = vld [vmem:[%s1837_s1] sm:$0xff]  ;;  %v1406_v3 = vmov 1   ;;  %v1407_v4 = vmov 3   ;;  %p379_p6 = scmp.lt.s32.totalorder %s1498_s17, 1 }
  0x39   : > { %1381 = vsyncadd (%p1859_p5), [#allocation6], 4294967168  ;;  %1248 = vset.pattern.permute.xlu0 %v1404_v0  ;;  %1250 = vset.pattern.permute.xlu1 %v1405_v1  ;;  %v386_v5 = vld [vmem:[#allocation2] sm:$0xff]  ;;  %v1408_v7 = vmov 4   ;;  %v1409_v8 = vmov 7   ;;  %v1410_v9 = vmov 8   ;;  %v395_v12 = vlaneseq }
  0x3a   : > { %391 = vperm.xlu0 %1248, %v385_v2   ;;  %444 = vperm.xlu1 %1250, %v385_v2   ;;  %v495_v6 = vld [vmem:[%s1838_s2] sm:$0xff]  ;;  %v1411_v10 = vmov 5   ;;  %v1412_v11 = vmov 6   ;;  %s380_s30 = scalar_select %p379_p6, %s1498_s17, 1  ;;  %v387_v63 = vld [vmem:[#allocation5] sm:$0xff] }
  0x3b   : > { %v396_v13 = vshrl.u32 %v395_v12, 7  ;;  %s1860_s0 = sld [smem:[#allocation11_spill]]  ;;  %s1413_s21 = smov 17   ;;  %v755_v62 = vld [vmem:[%s1840_s4] sm:$0xff] }
  0x3c   : > { %s1169_s11 = sshll.u32 %s380_s30, 3  ;;  %s1414_s26 = smov 16  }
  0x3d   : > { %v1591_v14 = vsub.s32 0, %v396_v13  ;;  %v1593_v15 = vsub.s32 4, %v396_v13  ;;  %v1595_v16 = vsub.s32 1, %v396_v13  ;;  %v1597_v17 = vsub.s32 5, %v396_v13  ;;  %s1415_s25 = smov 15   ;;  %s1416_s27 = smov 1  }
  0x3e   : > { %1249 = vset.pattern.permute.xlu0 %v1406_v3  ;;  %1251 = vset.pattern.permute.xlu1 %v1407_v4  ;;  %v1601_v19 = vsub.s32 2, %v396_v13  ;;  %v1603_v20 = vsub.s32 6, %v396_v13  ;;  %v1605_v21 = vsub.s32 3, %v396_v13  ;;  %v1607_v22 = vsub.s32 7, %v396_v13  ;;  %s1417_s28 = smov 127   ;;  %s1418_s29 = smov 113  }
  0x3f   : > { %418 = vperm.xlu0 %1249, %v385_v2   ;;  %470 = vperm.xlu1 %1251, %v385_v2   ;;  %s1419_s12 = smov 112   ;;  %v894_v2 = vld [vmem:[%s1843_s7] sm:$0xff]  ;;  %p1861_p12 = scmp.ne.s32.totalorder %s1851_s23, 0 }
  0x40   : > { %s1421_s18 = smov [#allocation7]  }
  0x41   : > { %s383_s20 = scalar_lea.vmem %s1860_s0, %s1169_s11 }
  0x42   : > { %v1599_v18 = vld [vmem:[%s383_s20] sm:$0xff]  ;;  %s376_s20 = sand.u32 1, %s1392_s14  }
  0x43   : > { %560 = vperm.xlu0 %1249, %v386_v5   ;;  %1252 = vset.pattern.permute.xlu1 %v1404_v0  ;;  %v398_v23 = vrot.slane %v1599_v18, %v1591_v14  ;;  %v402_v24 = vrot.slane %v1599_v18, %v1593_v15  ;;  %v424_v25 = vrot.slane %v1599_v18, %v1595_v16  ;;  %s1051_s11 = scalar_lea.sflag [#allocation4], %s376_s20 }
  0x44   : > { %498 = vperm.xlu1 %1252, %v495_v6   ;;  %v428_v26 = vrot.slane %v1599_v18, %v1597_v17  ;;  %v450_v27 = vrot.slane %v1599_v18, %v1601_v19  ;;  %v454_v28 = vrot.slane %v1599_v18, %v1603_v20  ;;  %v476_v31 = vrot.slane %v1599_v18, %v1605_v21  ;;  %v1033_v6 = vld [vmem:[%s1845_s9] sm:$0xf] }
  0x45   : > { %v480_v32 = vrot.slane %v1599_v18, %v1607_v22  ;;  %v408_v33 = vrot.slane %v398_v23, %v1591_v14  ;;  %v412_v34 = vrot.slane %v402_v24, %v1591_v14  ;;  %v434_v35 = vrot.slane %v424_v25, %v1595_v16 }
  0x46   : > { %v438_v36 = vrot.slane %v428_v26, %v1595_v16  ;;  %v460_v37 = vrot.slane %v450_v27, %v1601_v19  ;;  %v464_v38 = vrot.slane %v454_v28, %v1601_v19  ;;  %v486_v39 = vrot.slane %v476_v31, %v1605_v21  ;;  %v514_v31 = vld [vmem:[%s1841_s5] ss:$8 sm:$0x3] }
  0x47   : > { %1255 = vset.pattern.permute.xlu0 %v1408_v7  ;;  %v490_v40 = vrot.slane %v480_v32, %v1605_v21  ;;  %v1158_v32 = vld [vmem:[%s1841_s5 + $0x2] ss:$8 sm:$0x3] }
  0x48   : > { %628 = vperm.xlu0 %1255, %v386_v5   ;;  %1253 = vset.pattern.permute.xlu1 %v1405_v1 }
  0x49   : > { %590 = vperm.xlu1 %1253, %v386_v5  }
  0x4c   : > { %1258 = vset.pattern.permute.xlu0 %v1409_v8 }
  0x4d   : > { %1254 = vset.pattern.permute.xlu1 %v1407_v4  ;;  %718 = vperm.xlu0 %1258, %v386_v5  }
  0x4e   : > { %620 = vperm.xlu1 %1254, %v386_v5  }
  0x51   : > { %1259 = vset.pattern.permute.xlu0 %v1410_v9 }
  0x52   : > { %1256 = vset.pattern.permute.xlu1 %v1411_v10  ;;  %748 = vperm.xlu0 %1259, %v386_v5  }
  0x53   : > { %658 = vperm.xlu1 %1256, %v386_v5  }
  0x56   : > { %1260 = vset.pattern.permute.xlu0 %v1404_v0 }
  0x57   : > { %1257 = vset.pattern.permute.xlu1 %v1412_v11  ;;  %530 = vperm.xlu0 %1260, %v386_v5  }
  0x58   : > { %688 = vperm.xlu1 %1257, %v386_v5   ;;  %v388_v5 = vld [vmem:[%s1844_s8] sm:$0xf] }
  0x5c   : > { %1261 = vset.pattern.permute.xlu1 %v1404_v0 }
  0xb5   : > { %v392_v29 = vpop.permute.xlu0 %391  ;;  %v445_v30 = vpop.permute.xlu1 %444 }
  0xb6   : > { %v413_v43 = vmul.f32 %v408_v33, %v392_v29  ;;  %v414_v44 = vmul.f32 %v412_v34, %v392_v29  ;;  %v465_v47 = vmul.f32 %v460_v37, %v445_v30  ;;  %v466_v48 = vmul.f32 %v464_v38, %v445_v30  ;;  %v1157_v30 = vld [vmem:[%s1841_s5 + $0x1] ss:$8 sm:$0x3]  ;;  %v1159_v37 = vld [vmem:[%s1841_s5 + $0x3] ss:$8 sm:$0x3] }
  0xb7   : > { %v554_v33 = vrot.slane %v1157_v30, %v1595_v16  ;;  %v519_v34 = vrot.slane %v514_v31, %v1591_v14 }
  0xba   : > { %v419_v41 = vpop.permute.xlu0 %418  ;;  %v471_v42 = vpop.permute.xlu1 %470 }
  0xbb   : > { %v439_v45 = vmul.f32 %v434_v35, %v419_v41  ;;  %v440_v46 = vmul.f32 %v438_v36, %v419_v41  ;;  %v491_v51 = vmul.f32 %v486_v39, %v471_v42  ;;  %v492_v52 = vmul.f32 %v490_v40, %v471_v42 }
  0xbc   : > { %v523_v39 = vrot.slane %v514_v31, %v1595_v16  ;;  %v580_v40 = vrot.slane %v1158_v32, %v1591_v14  ;;  %v584_v41 = vrot.slane %v1158_v32, %v1595_v16 }
  0xbd   : > { %v441_v49 = vadd.f32 %v439_v45, %v413_v43  ;;  %v442_v50 = vadd.f32 %v440_v46, %v414_v44 }
  0xbf   : > { %v467_v53 = vadd.f32 %v465_v47, %v441_v49  ;;  %v468_v54 = vadd.f32 %v466_v48, %v442_v50  ;;  %v499_v55 = vpop.permute.xlu1 %498  ;;  %v610_v49 = vrot.slane %v1159_v37, %v1591_v14  ;;  %v614_v50 = vrot.slane %v1159_v37, %v1595_v16 }
  0xc1   : > { %v493_v56 = vadd.f32 %v491_v51, %v467_v53  ;;  %v494_v57 = vadd.f32 %v492_v52, %v468_v54 }
  0xc3   : > { %v501_v58 = vadd.f32 %v499_v55, %v493_v56  ;;  %v502_v59 = vadd.f32 %v499_v55, %v494_v57 }
  0xc5   : > { %v1633_v60 = vmax.f32 %v501_v58, 0.0  ;;  %v1635_v61 = vmax.f32 %v502_v59, 0.0 }
  0xc7   : > { %507 = vrot.lane.b32.xlu1 %v1635_v61, %s1413_s21  ;;  %505 = vrot.lane.b32.xlu0 %v1633_v60, %s1413_s21  ;;  %s1154_s21 = sshll.u32 %s376_s20, 3 }
  0xcb   : > { %537 = vrot.lane.b32.xlu1 %v1633_v60, %s1414_s26  ;;  %569 = vrot.lane.b32.xlu0 %v1635_v61, %s1415_s25 }
  0xcf   : > { %539 = vrot.lane.b32.xlu1 %v1635_v61, %s1414_s26  ;;  %597 = vrot.lane.b32.xlu0 %v1633_v60, %s1416_s27  ;;  %s1170_s26 = sshll.u32 %s1498_s17, 7  ;;  %s1336_s17 = sshll.u32 %s1421_s18, 4  ;;  %s1337_s17 = int_to_ptr.vmem [resolvable:$false] %s1336_s17 }
  0xd0   : > { %s1063_s30 = scalar_lea.hbm %s1846_s10, %s1170_s26 }
  0xd3   : > { %567 = vrot.lane.b32.xlu1 %v1633_v60, %s1415_s25  ;;  %637 = vrot.lane.b32.xlu0 %v1635_v61, %s1417_s28  ;;  %s1420_s25 = smov 111  }
  0xd7   : > { %599 = vrot.lane.b32.xlu1 %v1635_v61, %s1416_s27  ;;  %665 = vrot.lane.b32.xlu0 %v1633_v60, %s1418_s29 }
  0xdb   : > { %635 = vrot.lane.b32.xlu1 %v1633_v60, %s1417_s28  ;;  %758 = vperm.xlu0 %1260, %v755_v62  }
  0xdf   : > { %767 = vperm.xlu1 %1261, %v387_v63   ;;  %1263 = vset.pattern.permute.xlu0 %v1405_v1 }
  0xe0   : > { %799 = vperm.xlu0 %1263, %v387_v63  }
  0xe3   : > { %667 = vrot.lane.b32.xlu1 %v1635_v61, %s1418_s29 }
  0xe4   : > { %1262 = vset.pattern.permute.xlu1 %v1406_v3  ;;  %1266 = vset.pattern.permute.xlu0 %v1411_v10 }
  0xe5   : > { %847 = vperm.xlu0 %1266, %v387_v63  }
  0xe7   : > { %695 = vrot.lane.b32.xlu1 %v1633_v60, %s1419_s12 }
  0xe9   : > { %1269 = vset.pattern.permute.xlu0 %v1404_v0 }
  0xea   : > { %897 = vperm.xlu0 %1269, %v894_v2  }
  0xeb   : > { %697 = vrot.lane.b32.xlu1 %v1635_v61, %s1419_s12 }
  0xee   : > { %1272 = vset.pattern.permute.xlu0 %v1405_v1  ;;  %v1680_v1 = vpop.permute.xlu1 %590 }
  0xef   : > { %725 = vrot.lane.b32.xlu1 %v1633_v60, %s1420_s25  ;;  %938 = vperm.xlu0 %1272, %v388_v5  }
  0xf2   : > { %v1683_v9 = vpop.permute.xlu1 %620 }
  0xf3   : > { %727 = vrot.lane.b32.xlu1 %v1635_v61, %s1420_s25  ;;  %1275 = vset.pattern.permute.xlu0 %v1411_v10  ;;  %s378_s25 = scalar_lea.vmem [#allocation7], %s1154_s21  ;;  %s1338_s21 = scalar_lea.vmem %s1337_s17, 256 }
  0xf4   : > { %986 = vperm.xlu0 %1275, %v388_v5   ;;  %s1065_s27 = sshll.u32 %s378_s25, 4  ;;  %s1066_s27 = int_to_ptr.vmem [resolvable:$true] %s1065_s27 }
  0xf5   : > { %s1332_s12 = scalar_lea.vmem %s1066_s27, 128  ;;  %p1339_p8 = scmp.lt.s32.totalorder %s1066_s27, %s1337_s17 }
  0xf6   : > { %p1333_p10 = scmp.ne.s32.totalorder %s1066_s27, %s1332_s12  ;;  %p1340_p11 = scmp.lt.s32.totalorder %s1338_s21, %s1332_s12 }
  0xf7   : > { %783 = vperm.xlu1 %1262, %v387_v63  }
  0xf8   : > { %1278 = vset.pattern.permute.xlu0 %v1404_v0  ;;  %p1334_p4 = pnand %p1333_p10, %p1861_p12  ;;  %p1341_p0 = por %p1340_p11, %p1339_p8 }
  0xf9   : > { %1036 = vperm.xlu0 %1278, %v1033_v6  }
  0xfa   : > { %p1335_p7 = pneg %p1334_p4 }
  0xfb   : > { %1264 = vset.pattern.permute.xlu1 %v1407_v4 }
  0xfc   : > { %815 = vperm.xlu1 %1264, %v387_v63   ;;  %p1342_p1 = pnand %p1341_p0, %p1335_p7 }
 0x100   : > { %1265 = vset.pattern.permute.xlu1 %v1408_v7 }
 0x101   : > { %831 = vperm.xlu1 %1265, %v387_v63  }
 0x105   : > { %1267 = vset.pattern.permute.xlu1 %v1412_v11 }
 0x106   : > { %863 = vperm.xlu1 %1267, %v387_v63  }
 0x10a   : > { %1268 = vset.pattern.permute.xlu1 %v1409_v8 }
 0x10b   : > { %879 = vperm.xlu1 %1268, %v387_v63  }
 0x10f   : > { %1270 = vset.pattern.permute.xlu1 %v1404_v0  ;;  %v1686_v0 = vpop.permute.xlu1 %658 }
 0x110   : > { %906 = vperm.xlu1 %1270, %v388_v5  }
 0x113   : > { %v1688_v10 = vpop.permute.xlu1 %688 }
 0x114   : > { %1271 = vset.pattern.permute.xlu1 %v1406_v3  ;;  %v561_v3 = vpop.permute.xlu0 %560 }
 0x115   : > { %922 = vperm.xlu1 %1271, %v388_v5  }
 0x119   : > { %1273 = vset.pattern.permute.xlu1 %v1407_v4  ;;  %v1690_v4 = vpop.permute.xlu0 %628 }
 0x11a   : > { %954 = vperm.xlu1 %1273, %v388_v5  }
 0x11e   : > { %1274 = vset.pattern.permute.xlu1 %v1408_v7  ;;  %v1692_v7 = vpop.permute.xlu0 %718 }
 0x11f   : > { %970 = vperm.xlu1 %1274, %v388_v5  }
 0x122   : > { %v1694_v24 = vpop.permute.xlu0 %748 }
 0x123   : > { %1276 = vset.pattern.permute.xlu1 %v1412_v11 }
 0x124   : > { %1002 = vperm.xlu1 %1276, %v388_v5  }
 0x126   : > { %v531_v25 = vpop.permute.xlu0 %530 }
 0x128   : > { %1277 = vset.pattern.permute.xlu1 %v1409_v8  ;;  %v1697_v8 = vand.u32 127, %v395_v12  ;;  %v550_v12 = vrot.slane %v1157_v30, %v1591_v14 }
 0x129   : > { %1018 = vperm.xlu1 %1277, %v388_v5  }
 0x12a   : > { %vm541_vm0 = vcmp.lt.s32.totalorder %v1697_v8, 16  ;;  %vm511_vm1 = vcmp.lt.s32.totalorder %v1697_v8, 17  ;;  %vm571_vm2 = vcmp.lt.s32.totalorder %v1697_v8, 15  ;;  %vm601_vm3 = vcmp.lt.s32.totalorder %v1697_v8, 1 }
 0x12b   : > { %vm639_vm4 = vcmp.lt.s32.totalorder %v1697_v8, 127  ;;  %vm669_vm5 = vcmp.lt.s32.totalorder %v1697_v8, 113  ;;  %vm699_vm6 = vcmp.lt.s32.totalorder %v1697_v8, 112  ;;  %vm729_vm7 = vcmp.lt.s32.totalorder %v1697_v8, 111 }
 0x139   : > { %v508_v13 = vpop.permute.xlu1 %507  ;;  %v506_v27 = vpop.permute.xlu0 %505 }
 0x13a   : > { %v512_v42 = vsel %vm511_vm1, %v506_v27, %v508_v13  ;;  %v513_v43 = vsel %vm511_vm1, %v508_v13, %v506_v27 }
 0x13b   : > { %v526_v54 = vmul.f32 %v519_v34, %v513_v43  ;;  %v527_v55 = vmul.f32 %v523_v39, %v512_v42 }
 0x13d   : > { %v538_v23 = vpop.permute.xlu1 %537  ;;  %v570_v29 = vpop.permute.xlu0 %569  ;;  %v533_v6 = vmul.f32 %v531_v25, %v526_v54  ;;  %v534_v13 = vmul.f32 %v531_v25, %v527_v55  ;;  %v1161_v25 = vld [vmem:[%s1841_s5 + $0x6] ss:$8 sm:$0x3] }
 0x13e   : > { %v682_v37 = vrot.slane %v1161_v25, %v1595_v16 }
 0x141   : > { %v540_v11 = vpop.permute.xlu1 %539  ;;  %v598_v44 = vpop.permute.xlu0 %597 }
 0x142   : > { %v542_v35 = vsel %vm541_vm0, %v538_v23, %v540_v11  ;;  %v543_v36 = vsel %vm541_vm0, %v540_v11, %v538_v23 }
 0x143   : > { %v557_v47 = vmul.f32 %v550_v12, %v543_v36  ;;  %v558_v48 = vmul.f32 %v554_v33, %v542_v35  ;;  %v1162_v35 = vld [vmem:[%s1841_s5 + $0x7] ss:$8 sm:$0x3]  ;;  %v678_v36 = vrot.slane %v1161_v25, %v1591_v14 }
 0x145   : > { %v568_v26 = vpop.permute.xlu1 %567  ;;  %v563_v58 = vmul.f32 %v561_v3, %v557_v47  ;;  %v564_v59 = vmul.f32 %v561_v3, %v558_v48  ;;  %v638_v2 = vpop.permute.xlu0 %637  ;;  %v631_v47 = vmul.f32 %v1690_v4, %v1633_v60  ;;  %v632_v48 = vmul.f32 %v1690_v4, %v1635_v61 }
 0x146   : > { %v572_v45 = vsel %vm571_vm2, %v568_v26, %v570_v29  ;;  %v573_v46 = vsel %vm571_vm2, %v570_v29, %v568_v26  ;;  %v1160_v26 = vld [vmem:[%s1841_s5 + $0x5] ss:$8 sm:$0x3] }
 0x147   : > { %v587_v56 = vmul.f32 %v580_v40, %v573_v46  ;;  %v588_v57 = vmul.f32 %v584_v41, %v572_v45  ;;  %v565_v27 = vadd.f32 %v563_v58, %v533_v6  ;;  %v648_v30 = vrot.slane %v1160_v26, %v1591_v14 }
 0x148   : > { %v708_v45 = vrot.slane %v1162_v35, %v1591_v14 }
 0x149   : > { %v600_v28 = vpop.permute.xlu1 %599  ;;  %v593_v23 = vmul.f32 %v1680_v1, %v587_v56  ;;  %v594_v11 = vmul.f32 %v1680_v1, %v588_v57  ;;  %v652_v1 = vrot.slane %v1160_v26, %v1595_v16  ;;  %v1163_v56 = vld [vmem:[%s1841_s5 + $0x10] ss:$8 sm:$0x3] }
 0x14a   : > { %v602_v51 = vsel %vm601_vm3, %v598_v44, %v600_v28  ;;  %v603_v52 = vsel %vm601_vm3, %v600_v28, %v598_v44  ;;  %v566_v28 = vadd.f32 %v564_v59, %v534_v13 }
 0x14b   : > { %v617_v62 = vmul.f32 %v610_v49, %v603_v52  ;;  %v618_v63 = vmul.f32 %v614_v50, %v602_v51  ;;  %v595_v32 = vadd.f32 %v593_v23, %v565_v27 }
 0x14c   : > { %v596_v12 = vadd.f32 %v594_v11, %v566_v28 }
 0x14d   : > { %v636_v38 = vpop.permute.xlu1 %635  ;;  %v623_v3 = vmul.f32 %v1683_v9, %v617_v62  ;;  %v624_v29 = vmul.f32 %v1683_v9, %v618_v63  ;;  %v666_v9 = vpop.permute.xlu0 %665  ;;  %v738_v63 = vrot.slane %v1163_v56, %v1591_v14 }
 0x14e   : > { %v640_v33 = vsel %vm639_vm4, %v636_v38, %v638_v2  ;;  %v641_v34 = vsel %vm639_vm4, %v638_v2, %v636_v38  ;;  %v712_v38 = vrot.slane %v1162_v35, %v1595_v16  ;;  %v742_v2 = vrot.slane %v1163_v56, %v1595_v16 }
 0x14f   : > { %v625_v39 = vadd.f32 %v623_v3, %v595_v32  ;;  %v626_v40 = vadd.f32 %v624_v29, %v596_v12  ;;  %v655_v43 = vmul.f32 %v648_v30, %v640_v33  ;;  %v656_v44 = vmul.f32 %v652_v1, %v641_v34 }
 0x151   : > { %v633_v54 = vadd.f32 %v631_v47, %v625_v39  ;;  %v634_v55 = vadd.f32 %v632_v48, %v626_v40  ;;  %v661_v57 = vmul.f32 %v1686_v0, %v655_v43  ;;  %v662_v58 = vmul.f32 %v1686_v0, %v656_v44 }
 0x153   : > { %v664_v6 = vadd.f32 %v662_v58, %v634_v55 }
 0x156   : > { %v759_v12 = vpop.permute.xlu0 %758 }
 0x15a   : > { %v1723_v53 = vpop.permute.xlu1 %767 }
 0x15b   : > { %v800_v43 = vpop.permute.xlu0 %799 }
 0x15e   : > { %v668_v5 = vpop.permute.xlu1 %667 }
 0x15f   : > { %v670_v41 = vsel %vm669_vm5, %v666_v9, %v668_v5  ;;  %v671_v42 = vsel %vm669_vm5, %v668_v5, %v666_v9  ;;  %v663_v5 = vadd.f32 %v661_v57, %v633_v54 }
 0x160   : > { %v685_v51 = vmul.f32 %v678_v36, %v670_v41  ;;  %v686_v52 = vmul.f32 %v682_v37, %v671_v42 }
 0x162   : > { %v696_v31 = vpop.permute.xlu1 %695  ;;  %v691_v61 = vmul.f32 %v1688_v10, %v685_v51  ;;  %v692_v4 = vmul.f32 %v1688_v10, %v686_v52 }
 0x164   : > { %v693_v27 = vadd.f32 %v691_v61, %v663_v5  ;;  %v694_v28 = vadd.f32 %v692_v4, %v664_v6 }
 0x166   : > { %v698_v46 = vpop.permute.xlu1 %697 }
 0x167   : > { %v700_v49 = vsel %vm699_vm6, %v696_v31, %v698_v46  ;;  %v701_v50 = vsel %vm699_vm6, %v698_v46, %v696_v31 }
 0x168   : > { %v715_v59 = vmul.f32 %v708_v45, %v700_v49  ;;  %v716_v62 = vmul.f32 %v712_v38, %v701_v50 }
 0x16a   : > { %v726_v60 = vpop.permute.xlu1 %725  ;;  %v721_v13 = vmul.f32 %v1692_v7, %v715_v59  ;;  %v722_v23 = vmul.f32 %v1692_v7, %v716_v62 }
 0x16c   : > { %v723_v29 = vadd.f32 %v721_v13, %v693_v27  ;;  %v724_v25 = vadd.f32 %v722_v23, %v694_v28 }
 0x16e   : > { %v728_v0 = vpop.permute.xlu1 %727 }
 0x16f   : > { %v730_v11 = vsel %vm729_vm7, %v726_v60, %v728_v0  ;;  %v731_v26 = vsel %vm729_vm7, %v728_v0, %v726_v60 }
 0x170   : > { %v745_v8 = vmul.f32 %v738_v63, %v730_v11  ;;  %v746_v3 = vmul.f32 %v742_v2, %v731_v26 }
 0x172   : > { %v751_v10 = vmul.f32 %v1694_v24, %v745_v8  ;;  %v752_v30 = vmul.f32 %v1694_v24, %v746_v3  ;;  %v784_v1 = vpop.permute.xlu1 %783 }
 0x174   : > { %v753_v31 = vadd.f32 %v751_v10, %v723_v29  ;;  %v754_v32 = vadd.f32 %v752_v30, %v724_v25 }
 0x176   : > { %v761_v33 = vadd.f32 %v759_v12, %v753_v31  ;;  %v762_v34 = vadd.f32 %v759_v12, %v754_v32 }
 0x177   : > { %v816_v7 = vpop.permute.xlu1 %815 }
 0x178   : > { %v763_v35 = vmax.f32 %v761_v33, 0.0  ;;  %v764_v9 = vmax.f32 %v762_v34, 0.0 }
 0x17a   : > { %v773_v36 = vrot.slane %v763_v35, %v1591_v14  ;;  %v777_v37 = vrot.slane %v764_v9, %v1591_v14  ;;  %v789_v39 = vrot.slane %v763_v35, %v1595_v16  ;;  %v793_v40 = vrot.slane %v764_v9, %v1595_v16 }
 0x17b   : > { %v821_v41 = vrot.slane %v763_v35, %v1605_v21  ;;  %v825_v24 = vrot.slane %v764_v9, %v1605_v21  ;;  %v809_v42 = vrot.slane %v764_v9, %v1601_v19  ;;  %v805_v44 = vrot.slane %v763_v35, %v1601_v19 }
 0x17c   : > { %v778_v45 = vmul.f32 %v773_v36, %v1723_v53  ;;  %v779_v38 = vmul.f32 %v777_v37, %v1723_v53  ;;  %v794_v46 = vmul.f32 %v789_v39, %v784_v1  ;;  %v795_v47 = vmul.f32 %v793_v40, %v784_v1  ;;  %v832_v48 = vpop.permute.xlu1 %831  ;;  %v848_v53 = vpop.permute.xlu0 %847 }
 0x17d   : > { %v810_v51 = vmul.f32 %v805_v44, %v800_v43  ;;  %v811_v52 = vmul.f32 %v809_v42, %v800_v43  ;;  %v826_v54 = vmul.f32 %v821_v41, %v816_v7  ;;  %v827_v55 = vmul.f32 %v825_v24, %v816_v7 }
 0x17e   : > { %v796_v49 = vadd.f32 %v794_v46, %v778_v45  ;;  %v797_v50 = vadd.f32 %v795_v47, %v779_v38  ;;  %v837_v56 = vrot.slane %v763_v35, %v1593_v15  ;;  %v841_v57 = vrot.slane %v764_v9, %v1593_v15 }
 0x17f   : > { %v857_v62 = vrot.slane %v764_v9, %v1597_v17  ;;  %v853_v60 = vrot.slane %v763_v35, %v1597_v17  ;;  %v869_v6 = vrot.slane %v763_v35, %v1603_v20  ;;  %v873_v13 = vrot.slane %v764_v9, %v1603_v20 }
 0x180   : > { %v812_v58 = vadd.f32 %v810_v51, %v796_v49  ;;  %v813_v59 = vadd.f32 %v811_v52, %v797_v50  ;;  %v842_v2 = vmul.f32 %v837_v56, %v832_v48  ;;  %v843_v5 = vmul.f32 %v841_v57, %v832_v48  ;;  %v898_v34 = vpop.permute.xlu0 %897 }
 0x181   : > { %v864_v61 = vpop.permute.xlu1 %863  ;;  %v858_v23 = vmul.f32 %v853_v60, %v848_v53  ;;  %v859_v0 = vmul.f32 %v857_v62, %v848_v53  ;;  %v885_v27 = vrot.slane %v763_v35, %v1607_v22  ;;  %v889_v28 = vrot.slane %v764_v9, %v1607_v22 }
 0x182   : > { %v828_v4 = vadd.f32 %v826_v54, %v812_v58  ;;  %v829_v63 = vadd.f32 %v827_v55, %v813_v59  ;;  %v874_v29 = vmul.f32 %v869_v6, %v864_v61  ;;  %v875_v25 = vmul.f32 %v873_v13, %v864_v61 }
 0x184   : > { %v844_v11 = vadd.f32 %v842_v2, %v828_v4  ;;  %v845_v26 = vadd.f32 %v843_v5, %v829_v63  ;;  %v939_v46 = vpop.permute.xlu0 %938 }
 0x186   : > { %v860_v8 = vadd.f32 %v858_v23, %v844_v11  ;;  %v861_v3 = vadd.f32 %v859_v0, %v845_v26  ;;  %v880_v10 = vpop.permute.xlu1 %879 }
 0x187   : > { %v890_v30 = vmul.f32 %v885_v27, %v880_v10  ;;  %v891_v1 = vmul.f32 %v889_v28, %v880_v10 }
 0x188   : > { %v876_v31 = vadd.f32 %v874_v29, %v860_v8  ;;  %v877_v32 = vadd.f32 %v875_v25, %v861_v3  ;;  %v987_v5 = vpop.permute.xlu0 %986 }
 0x18a   : > { %v893_v12 = vadd.f32 %v891_v1, %v877_v32  ;;  %v892_v33 = vadd.f32 %v890_v30, %v876_v31 }
 0x18b   : > { %v907_v7 = vpop.permute.xlu1 %906 }
 0x18c   : > { %v900_v36 = vadd.f32 %v898_v34, %v892_v33  ;;  %v901_v37 = vadd.f32 %v898_v34, %v893_v12  ;;  %v1037_v31 = vpop.permute.xlu0 %1036 }
 0x18e   : > { %v902_v39 = vmax.f32 %v900_v36, 0.0  ;;  %v903_v40 = vmax.f32 %v901_v37, 0.0 }
 0x190   : > { %v912_v35 = vrot.slane %v902_v39, %v1591_v14  ;;  %v916_v9 = vrot.slane %v903_v40, %v1591_v14  ;;  %v948_v41 = vrot.slane %v903_v40, %v1601_v19  ;;  %v944_v24 = vrot.slane %v902_v39, %v1601_v19  ;;  %v923_v42 = vpop.permute.xlu1 %922 }
 0x191   : > { %v928_v43 = vrot.slane %v902_v39, %v1595_v16  ;;  %v932_v44 = vrot.slane %v903_v40, %v1595_v16  ;;  %v960_v14 = vrot.slane %v902_v39, %v1605_v21  ;;  %v964_v55 = vrot.slane %v903_v40, %v1605_v21 }
 0x192   : > { %v917_v45 = vmul.f32 %v912_v35, %v907_v7  ;;  %v918_v38 = vmul.f32 %v916_v9, %v907_v7  ;;  %v949_v49 = vmul.f32 %v944_v24, %v939_v46  ;;  %v950_v50 = vmul.f32 %v948_v41, %v939_v46 }
 0x193   : > { %v933_v47 = vmul.f32 %v928_v43, %v923_v42  ;;  %v934_v48 = vmul.f32 %v932_v44, %v923_v42  ;;  %v976_v16 = vrot.slane %v902_v39, %v1593_v15  ;;  %v980_v59 = vrot.slane %v903_v40, %v1593_v15 }
 0x194   : > { %v996_v62 = vrot.slane %v903_v40, %v1597_v17  ;;  %v992_v60 = vrot.slane %v902_v39, %v1597_v17  ;;  %v1008_v11 = vrot.slane %v902_v39, %v1603_v20  ;;  %v1012_v15 = vrot.slane %v903_v40, %v1603_v20 }
 0x195   : > { %v935_v51 = vadd.f32 %v933_v47, %v917_v45  ;;  %v936_v52 = vadd.f32 %v934_v48, %v918_v38  ;;  %v955_v54 = vpop.permute.xlu1 %954  ;;  %v1024_v8 = vrot.slane %v902_v39, %v1607_v22  ;;  %v1028_v3 = vrot.slane %v903_v40, %v1607_v22 }
 0x196   : > { %v965_v57 = vmul.f32 %v960_v14, %v955_v54  ;;  %v966_v58 = vmul.f32 %v964_v55, %v955_v54  ;;  %v997_v13 = vmul.f32 %v992_v60, %v987_v5  ;;  %v998_v23 = vmul.f32 %v996_v62, %v987_v5 }
 0x197   : > { %v951_v19 = vadd.f32 %v949_v49, %v935_v51  ;;  %v952_v56 = vadd.f32 %v950_v50, %v936_v52  ;;  %v1041_v20 = vcombine.high %v1599_v18, %v1599_v18 }
 0x199   : > { %v967_v61 = vadd.f32 %v965_v57, %v951_v19  ;;  %v968_v4 = vadd.f32 %v966_v58, %v952_v56 }
 0x19a   : > { %v971_v53 = vpop.permute.xlu1 %970 }
 0x19b   : > { %v981_v63 = vmul.f32 %v976_v16, %v971_v53  ;;  %v982_v2 = vmul.f32 %v980_v59, %v971_v53 }
 0x19d   : > { %v983_v21 = vadd.f32 %v981_v63, %v967_v61  ;;  %v984_v6 = vadd.f32 %v982_v2, %v968_v4 }
 0x19f   : > { %v1003_v0 = vpop.permute.xlu1 %1002  ;;  %v999_v26 = vadd.f32 %v997_v13, %v983_v21  ;;  %v1000_v27 = vadd.f32 %v998_v23, %v984_v6 }
 0x1a0   : > { %v1013_v28 = vmul.f32 %v1008_v11, %v1003_v0  ;;  %v1014_v17 = vmul.f32 %v1012_v15, %v1003_v0 }
 0x1a2   : > { %v1015_v25 = vadd.f32 %v1013_v28, %v999_v26  ;;  %v1016_v10 = vadd.f32 %v1014_v17, %v1000_v27 }
 0x1a4   : > { %v1019_v29 = vpop.permute.xlu1 %1018 }
 0x1a5   : > { %v1029_v30 = vmul.f32 %v1024_v8, %v1019_v29  ;;  %v1030_v1 = vmul.f32 %v1028_v3, %v1019_v29 }
 0x1a7   : > { %v1032_v32 = vadd.f32 %v1030_v1, %v1016_v10  ;;  %v1031_v12 = vadd.f32 %v1029_v30, %v1015_v25 }
 0x1a9   : > { %v1039_v33 = vadd.f32 %v1037_v31, %v1031_v12  ;;  %v1040_v34 = vadd.f32 %v1037_v31, %v1032_v32 }
 0x1ab   : > { %v1043_v22 = vadd.f32 %v1039_v33, %v1599_v18  ;;  %v1044_v7 = vadd.f32 %v1041_v20, %v1040_v34 }
 0x1ad   : > { %v1047_v36 = vcombine.low %v1043_v22, %v1044_v7 }
 0x1af   : > { %1049 = vst [vmem:[%s378_s25] sm:$0xff] %v1047_v36 }
 0x1b0   : > { %1345 = shalt.err (!%p1342_p1)
}
 0x1b1   : > { %s1346_s0 = scalar_lea.hbm %s1063_s30, 128  ;;  %s1350_s25 = scalar_lea.hbm %s1846_s10, 256 }
 0x1b2   : > { %p1347_p2 = scmp.ne.s32.totalorder %s1063_s30, %s1346_s0  ;;  %p1351_p9 = scmp.lt.s32.totalorder %s1063_s30, %s1846_s10 }
 0x1b3   : > { %p1352_p5 = scmp.lt.s32.totalorder %s1350_s25, %s1346_s0 }
 0x1b4   : > { %p1348_p3 = pnand %p1347_p2, %p1861_p12 }
 0x1b5   : > { %p1353_p6 = por %p1352_p5, %p1351_p9 }
 0x1b6   : > { %p1349_p13 = pneg %p1348_p3 }
 0x1b8   : > { %p1354_p10 = pnand %p1353_p6, %p1349_p13 }
 0x1ba   : > { %1357 = shalt.err (!%p1354_p10)
}
 0x1bb   : > { %1179 = dma.vmem_to_hbm [thread:$0]  (%p1861_p12), %s1066_s27, 128, %s1063_s30, %s1051_s11  }
 0x1bc PF: > { %p1196_p4 = scmp.ge.s32.totalorder %s1400_s16, 2  ;;  %s1077_s12 = sand.u32 1, %s1388_s13  }
 0x1bd   : > { %p1862_p7 = scmp.ne.s32.totalorder %s1852_s24, 0  ;;  %s1078_s18 = scalar_lea.sflag [#allocation4], %s1077_s12 }
 0x1bf   : > { %p1189_p8 = pnand %p1196_p4, %p1862_p7 }
 0x1c1   : > { %p1190_p11 = pneg %p1189_p8 }
 0x1c3   : > { %1383 = dma.done.wait (%p1190_p11), %s1078_s18, 128  }
 0x1c4   : > { %1385 = vsyncadd (%p1190_p11), %s1078_s18, 4294967168  ;;  %p22_p0 = scmp.ge.s32.totalorder %s1502_s19, 4   ;;  %s1863_s13 = smov %s1392_s14 }
 0x1c5   : > { %s1864_s14 = smov %s1396_s15  ;;  %s1865_s15 = smov %s1513_s22 }
 0x1c6   : > { %s1866_s16 = smov %s1502_s19  ;;  %24 = sbr.rel (!%p22_p0) target bundleno = 7 (0x7), region = 111 }
 0x1cb   :  { %1083 = vsyncpa [#allocation3], 1 }
 0x1cc   :  { %1085 = vsyncpa [#allocation3 + $0x1], 1 }
 0x1cd   :  { %1086 = vsyncpa [#allocation6], 1 }
 0x1ce   :  { %1087 = vsyncpa [#allocation4], 1 }
 0x1cf   :  { %1089 = vsyncpa [#allocation4 + $0x1], 1 }

</bundles_post_ra>
